<compile_context>
chip_gen: v7x
topology: tpu7x:2x2x1
jax: 0.10.0
libtpu: 0.0.40
codegen_flags: <defaults>
</compile_context>

<pallas_src>
import functools

import jax
import jax.numpy as jnp
from jax.experimental import pallas as pl
from jax.experimental.pallas import tpu as pltpu


def _mha_kernel(x_ref, w_ref, mask_ref, o_ref, *, num_heads, d_out):
    """One batch element per grid step; all heads + Q/K/V batched inside the kernel.

    x_ref    : (1, T, d_in)         activations for this batch element
    w_ref    : (3*H, d_out, d_in)   per-head weights, rows = [Q_h0..Q_h(H-1) | K... | V...]
    mask_ref : (T, T)               additive causal mask (0 on/below diag, -1e30 above)
    o_ref    : (1, T, H*d_out)      heads concatenated on the last dim
    """
    H = num_heads
    T = x_ref.shape[1]
    d_in = x_ref.shape[2]
    scale = 1.0 / (float(d_out) ** 0.5)

    x = x_ref[0]                                                    # (T, d_in)
    xb = jnp.broadcast_to(x[None, :, :], (3 * H, T, d_in))          # (3H, T, d_in)

    # Single batched MXU contraction for all Q/K/V projections of all heads
    # (one batch dim, contract last dims) — no per-head lane slicing.
    qkv = jnp.einsum("gti,gei->gte", xb, w_ref[...],
                     preferred_element_type=jnp.float32)            # (3H, T, d_out)

    q = qkv[0:H] * scale            # fold 1/sqrt(d_out) into q; leading-dim slices only
    k = qkv[H:2 * H]
    v = qkv[2 * H:3 * H]            # each (H, T, d_out)

    # All heads at once: batched q @ k^T, additive causal mask, stable softmax.
    scores = jnp.einsum("hqd,hkd->hqk", q, k,
                        preferred_element_type=jnp.float32)         # (H, T, T)
    scores = scores + mask_ref[...]                                 # broadcast over heads

    m = jnp.max(scores, axis=-1, keepdims=True)
    p = jnp.exp(scores - m)
    denom = jnp.sum(p, axis=-1, keepdims=True)
    attn = p * pl.reciprocal(denom, approx=False)                   # exact reciprocal

    ctx = jnp.einsum("hqk,hkd->hqd", attn, v,
                     preferred_element_type=jnp.float32)            # (H, T, d_out)

    # Store each head directly at its lane offset in the fused (T, H*d_out) layout
    # (== torch.cat([...], dim=-1)); no in-kernel concatenate.
    for h in range(H):              # static unroll, H is small
        o_ref[0, :, h * d_out:(h + 1) * d_out] = ctx[h].astype(o_ref.dtype)


def multi_head_attention_wrapper(x, wq, wk, wv):
    """x: (B, T, d_in); wq/wk/wv: (H, d_in, d_out) -> (B, T, H*d_out)."""
    B, T, d_in = x.shape
    H, _, d_out = wq.shape
    HD = H * d_out

    # Stack all per-head Q/K/V weights, pre-transposed to (d_out, d_in), so the kernel's
    # projection is one batched contract-last-dims matmul.
    def _t(w):                       # (H, d_in, d_out) -> (H, d_out, d_in)
        return jnp.swapaxes(w, 1, 2)

    w_stk = jnp.concatenate([_t(wq), _t(wk), _t(wv)], axis=0)        # (3H, d_out, d_in)

    # Additive causal mask (strict upper triangle -> large finite negative), built once.
    causal = jnp.triu(jnp.ones((T, T), dtype=bool), k=1)
    mask_add = jnp.where(causal, jnp.float32(-1e30), jnp.float32(0.0))   # (T, T)

    kernel = functools.partial(_mha_kernel, num_heads=H, d_out=d_out)

    return pl.pallas_call(
        kernel,
        out_shape=jax.ShapeDtypeStruct((B, T, HD), jnp.float32),
        grid=(B,),                               # >=2 parallel steps -> both v7x TCs
        in_specs=[
            pl.BlockSpec((1, T, d_in), lambda b: (b, 0, 0)),          # x: 1 DMA / batch elem
            pl.BlockSpec((3 * H, d_out, d_in), lambda b: (0, 0, 0)),  # weights: resident
            pl.BlockSpec((T, T), lambda b: (0, 0)),                   # additive mask: resident
        ],
        out_specs=pl.BlockSpec((1, T, HD), lambda b: (b, 0, 0)),      # fused concat layout
        compiler_params=pltpu.CompilerParams(
            dimension_semantics=("parallel",)),
    )(x, w_stk, mask_add)


def _reference(x, wq, wk, wv):
    """Pure-JAX reference mirroring the PyTorch forward (dropout = identity)."""
    B, T, d_in = x.shape
    H, _, d_out = wq.shape
    hp = jax.lax.Precision.HIGHEST
    mask = jnp.triu(jnp.ones((T, T), dtype=bool), k=1)
    outs = []
    for h in range(H):
        q = jnp.einsum("bti,io->bto", x, wq[h], precision=hp)
        k = jnp.einsum("bti,io->bto", x, wk[h], precision=hp)
        v = jnp.einsum("bti,io->bto", x, wv[h], precision=hp)
        scores = jnp.einsum("btd,bsd->bts", q, k, precision=hp)
        scores = jnp.where(mask[None], -jnp.inf, scores)
        w = jax.nn.softmax(scores / (d_out ** 0.5), axis=-1)
        outs.append(jnp.einsum("bts,bsd->btd", w, v, precision=hp))
    return jnp.concatenate(outs, axis=-1)


if __name__ == "__main__":
    # Shapes implied by the module's usage in chap03: d_in=3, d_out=2,
    # context_length = T = 6, batch B = 2, num_heads H = 2, dropout = 0.0 (identity).
    B, T, d_in, d_out, H = 2, 6, 3, 2, 2

    key = jax.random.PRNGKey(0)
    kx, kq, kk, kv = jax.random.split(key, 4)
    x = jax.random.uniform(kx, (B, T, d_in), dtype=jnp.float32)
    # deterministic "nn.Linear"-style weights (no bias, qkv_bias=False)
    wq = jax.random.uniform(kq, (H, d_in, d_out), dtype=jnp.float32, minval=-0.5, maxval=0.5)
    wk = jax.random.uniform(kk, (H, d_in, d_out), dtype=jnp.float32, minval=-0.5, maxval=0.5)
    wv = jax.random.uniform(kv, (H, d_in, d_out), dtype=jnp.float32, minval=-0.5, maxval=0.5)

    out = multi_head_attention_wrapper(x, wq, wk, wv)
    out = jax.block_until_ready(out)

    ref = _reference(x, wq, wk, wv)
    assert out.shape == (B, T, H * d_out), out.shape
    # The softmax reciprocal is now exact; the remaining tolerance slack covers the
    # default f32-on-MXU matmul precision of the in-kernel dots vs. the HIGHEST-precision
    # reference (not the reciprocal).
    assert jnp.allclose(out, ref, atol=2e-3, rtol=2e-3), "mismatch vs reference"

    print("KERNEL_OK")
</pallas_src>

<mosaic_0001>
module attributes {stable_mosaic.version = 11 : i64} {
  func.func @_mha_kernel(%arg0: i32, %arg1: memref<1x6x3xf32, #tpu.memory_space<vmem>>, %arg2: memref<6x2x3xf32, #tpu.memory_space<vmem>>, %arg3: memref<6x6xf32, #tpu.memory_space<vmem>>, %arg4: memref<1x6x4xf32, #tpu.memory_space<vmem>>) attributes {dimension_semantics = [#tpu.dimension_semantics<parallel>], iteration_bounds = array<i64: 2>, scalar_prefetch = 0 : i64, scratch_operands = 0 : i64, tpu.core_type = #tpu.core_type<tc>, window_params = [{transform_indices = @transform_0, window_bounds = array<i64: 1, 6, 3>}, {pipeline_mode = #tpu.pipeline_mode<synchronous>, transform_indices = @transform_1, window_bounds = array<i64: 6, 2, 3>}, {pipeline_mode = #tpu.pipeline_mode<synchronous>, transform_indices = @transform_2, window_bounds = array<i64: 6, 6>}, {transform_indices = @transform_3, window_bounds = array<i64: 1, 6, 4>}]} {
    %c0 = arith.constant 0 : index
    %c0_0 = arith.constant 0 : index
    %c0_1 = arith.constant 0 : index
    %0 = vector.load %arg1[%c0, %c0_0, %c0_1] : memref<1x6x3xf32, #tpu.memory_space<vmem>>, vector<1x6x3xf32>
    %1 = vector.shape_cast %0 : vector<1x6x3xf32> to vector<6x3xf32>
    %2 = vector.shape_cast %1 : vector<6x3xf32> to vector<1x6x3xf32>
    %3 = vector.shape_cast %2 : vector<1x6x3xf32> to vector<1x6x3xf32>
    %4 = vector.broadcast %3 : vector<1x6x3xf32> to vector<6x6x3xf32>
    %c0_2 = arith.constant 0 : index
    %c0_3 = arith.constant 0 : index
    %c0_4 = arith.constant 0 : index
    %5 = vector.load %arg2[%c0_2, %c0_3, %c0_4] : memref<6x2x3xf32, #tpu.memory_space<vmem>>, vector<6x2x3xf32>
    "tpu.trace_start"() <{level = 10 : i32, message = "gti,gei->gte"}> : () -> ()
    %cst = arith.constant dense<0.000000e+00> : vector<6x6x2xf32>
    %6 = tpu.matmul %4, %5, %cst {dimension_numbers = #tpu.dot_dimension_numbers<[2], [2], [1], [1], [0, 0, 0, 1, 1, 1], [0], [0]>} : vector<6x6x3xf32>, vector<6x2x3xf32>, vector<6x6x2xf32> -> vector<6x6x2xf32>
    "tpu.trace_stop"() : () -> ()
    %7 = vector.extract_strided_slice %6 {offsets = [0, 0, 0], sizes = [2, 6, 2], strides = [1, 1, 1]} : vector<6x6x2xf32> to vector<2x6x2xf32>
    %cst_5 = arith.constant 0.707106769 : f32
    %8 = vector.broadcast %cst_5 : f32 to vector<2x6x2xf32>
    %9 = arith.mulf %7, %8 : vector<2x6x2xf32>
    %10 = vector.extract_strided_slice %6 {offsets = [2, 0, 0], sizes = [2, 6, 2], strides = [1, 1, 1]} : vector<6x6x2xf32> to vector<2x6x2xf32>
    %11 = vector.extract_strided_slice %6 {offsets = [4, 0, 0], sizes = [2, 6, 2], strides = [1, 1, 1]} : vector<6x6x2xf32> to vector<2x6x2xf32>
    "tpu.trace_start"() <{level = 10 : i32, message = "hqd,hkd->hqk"}> : () -> ()
    %cst_6 = arith.constant dense<0.000000e+00> : vector<2x6x6xf32>
    %12 = tpu.matmul %9, %10, %cst_6 {dimension_numbers = #tpu.dot_dimension_numbers<[2], [2], [1], [1], [0, 0, 0, 1, 1, 1], [0], [0]>} : vector<2x6x2xf32>, vector<2x6x2xf32>, vector<2x6x6xf32> -> vector<2x6x6xf32>
    "tpu.trace_stop"() : () -> ()
    %c0_7 = arith.constant 0 : index
    %c0_8 = arith.constant 0 : index
    %13 = vector.load %arg3[%c0_7, %c0_8] : memref<6x6xf32, #tpu.memory_space<vmem>>, vector<6x6xf32>
    %14 = vector.shape_cast %13 : vector<6x6xf32> to vector<1x6x6xf32>
    %15 = vector.broadcast %14 : vector<1x6x6xf32> to vector<2x6x6xf32>
    %16 = arith.addf %12, %15 : vector<2x6x6xf32>
    %cst_9 = arith.constant dense<0xFF800000> : vector<2x6xf32>
    %17 = vector.multi_reduction <maximumf>, %16, %cst_9 [2] : vector<2x6x6xf32> to vector<2x6xf32>
    %18 = vector.shape_cast %17 : vector<2x6xf32> to vector<2x6x1xf32>
    %19 = vector.broadcast %18 : vector<2x6x1xf32> to vector<2x6x6xf32>
    %20 = arith.subf %16, %19 : vector<2x6x6xf32>
    %21 = math.exp %20 : vector<2x6x6xf32>
    %cst_10 = arith.constant dense<0.000000e+00> : vector<2x6xf32>
    %22 = vector.multi_reduction <add>, %21, %cst_10 [2] : vector<2x6x6xf32> to vector<2x6xf32>
    %23 = vector.shape_cast %22 : vector<2x6xf32> to vector<2x6x1xf32>
    %24 = tpu.reciprocal %23 : vector<2x6x1xf32> -> vector<2x6x1xf32>
    %25 = vector.broadcast %24 : vector<2x6x1xf32> to vector<2x6x6xf32>
    %26 = arith.mulf %21, %25 : vector<2x6x6xf32>
    "tpu.trace_start"() <{level = 10 : i32, message = "hqk,hkd->hqd"}> : () -> ()
    %cst_11 = arith.constant dense<0.000000e+00> : vector<2x6x2xf32>
    %27 = tpu.matmul %26, %11, %cst_11 {dimension_numbers = #tpu.dot_dimension_numbers<[2], [1], [1], [2], [0, 0, 0, 1, 1, 2], [0], [0]>} : vector<2x6x6xf32>, vector<2x6x2xf32>, vector<2x6x2xf32> -> vector<2x6x2xf32>
    "tpu.trace_stop"() : () -> ()
    %28 = vector.extract_strided_slice %27 {offsets = [0, 0, 0], sizes = [1, 6, 2], strides = [1, 1, 1]} : vector<2x6x2xf32> to vector<1x6x2xf32>
    %29 = vector.shape_cast %28 : vector<1x6x2xf32> to vector<6x2xf32>
    %c0_12 = arith.constant 0 : index
    %c0_13 = arith.constant 0 : index
    %c0_14 = arith.constant 0 : index
    %30 = vector.load %arg4[%c0_12, %c0_13, %c0_14] : memref<1x6x4xf32, #tpu.memory_space<vmem>>, vector<1x6x2xf32>
    %31 = vector.shape_cast %30 : vector<1x6x2xf32> to vector<6x2xf32>
    %32 = vector.shape_cast %29 : vector<6x2xf32> to vector<1x6x2xf32>
    tpu.vector_store %arg4[%c0_12, %c0_13, %c0_14], %32 {strides = array<i32>} : memref<1x6x4xf32, #tpu.memory_space<vmem>>, vector<1x6x2xf32>,
    %33 = vector.extract_strided_slice %27 {offsets = [1, 0, 0], sizes = [1, 6, 2], strides = [1, 1, 1]} : vector<2x6x2xf32> to vector<1x6x2xf32>
    %34 = vector.shape_cast %33 : vector<1x6x2xf32> to vector<6x2xf32>
    %c0_15 = arith.constant 0 : index
    %c0_16 = arith.constant 0 : index
    %c2 = arith.constant 2 : index
    %35 = vector.load %arg4[%c0_15, %c0_16, %c2] : memref<1x6x4xf32, #tpu.memory_space<vmem>>, vector<1x6x2xf32>
    %36 = vector.shape_cast %35 : vector<1x6x2xf32> to vector<6x2xf32>
    %37 = vector.shape_cast %34 : vector<6x2xf32> to vector<1x6x2xf32>
    tpu.vector_store %arg4[%c0_15, %c0_16, %c2], %37 {strides = array<i32>} : memref<1x6x4xf32, #tpu.memory_space<vmem>>, vector<1x6x2xf32>,
    return
  }
  func.func @transform_0(%arg0: i32) -> (i32, i32, i32) {
    %c0_i32 = arith.constant 0 : i32
    %c0_i32_0 = arith.constant 0 : i32
    %c0_i32_1 = arith.constant 0 : i32
    return %arg0, %c0_i32, %c0_i32_0 : i32, i32, i32
  }
  func.func @transform_1(%arg0: i32) -> (i32, i32, i32) {
    %c0_i32 = arith.constant 0 : i32
    %c0_i32_0 = arith.constant 0 : i32
    %c0_i32_1 = arith.constant 0 : i32
    %c0_i32_2 = arith.constant 0 : i32
    return %c0_i32, %c0_i32_0, %c0_i32_1 : i32, i32, i32
  }
  func.func @transform_2(%arg0: i32) -> (i32, i32) {
    %c0_i32 = arith.constant 0 : i32
    %c0_i32_0 = arith.constant 0 : i32
    %c0_i32_1 = arith.constant 0 : i32
    return %c0_i32, %c0_i32_0 : i32, i32
  }
  func.func @transform_3(%arg0: i32) -> (i32, i32, i32) {
    %c0_i32 = arith.constant 0 : i32
    %c0_i32_0 = arith.constant 0 : i32
    %c0_i32_1 = arith.constant 0 : i32
    return %arg0, %c0_i32, %c0_i32_0 : i32, i32, i32
  }
}

</mosaic_0001>

<bundles_post_ra>
// kernel: tpu_custom_call.1
= control target key start
LH: loop header
LB: loop body
LE: loop exit
PB: predicated region body
PF: predicated region fallthrough
CT: control target
= control target key end

     0   :  { %s1158_s12 = smov 0   ;;  %s1229_s0 = inlined_call_operand.vmem [shape: f32[2,6,3], index: 0, kind: input, shape index: {}]   ;;  %s1230_s1 = inlined_call_operand.vmem [shape: f32[6,2,3], index: 1, kind: input, shape index: {}]   ;;  %s1231_s2 = inlined_call_operand.vmem [shape: f32[6,6], index: 2, kind: input, shape index: {}]   ;;  %s1232_s3 = inlined_call_operand.vmem [shape: f32[2,6,4], index: 3, kind: output, shape index: {}]  }
   0x1 LB: > { %s1009_s13 = sadd.s32 4294967295, %s1133_s12   ;;  %p1013_p0 = scmp.ge.s32.totalorder %s1133_s12, 1  ;;  %s1133_s12 = sphi %s1158_s12, %s13_s12  }
   0x2   : > { %p136_p1 = scmp.lt.s32.totalorder %s1133_s12, 3 }
   0x4   : > { %p137_p2 = pnand %p1013_p0, %p136_p1 }
   0x5   : > { %v168_v0 = vld [vmem:[%s1230_s1 + $0x2] sm:$0x3] (!%p137_p2)  ;;  %vm173_vm0 = vcmask (!%p137_p2), 23552   ;;  %p158_p3 = scmp.lt.s32.totalorder (!%p137_p2), %s1009_s13, 1  ;;  %v1135_v1 = vmov (!%p137_p2), 0.0   ;;  %vm1136_vm1 = vmmov (!%p137_p2), 0  }
   0x6   : > { %140 = sbr.rel (%p137_p2) target bundleno = 1092 (0x444), region = 32  ;;  %1063 = vmatprep.subr.mxu1 (!%p137_p2), %v1135_v1  ;;  %1065 = vmatprep.mubr.msk.f32.mxu1 (!%p137_p2), %vm1136_vm1, %v1135_v1  ;;  %v167_v2 = vld [vmem:[%s1230_s1] sm:$0x3] (!%p137_p2)  ;;  %v170_v3 = vld [vmem:[%s1230_s1 + $0x6] sm:$0x3] (!%p137_p2)  ;;  %vm618_vm2 = vcmask (!%p137_p2), 15360  }
   0x7   : > { %1064 = vmatpush3.xpose.msk.msra.mxu1 (!%p137_p2), %vm173_vm0, %v168_v0  ;;  %1058 = vmatprep.subr.mxu0 (!%p137_p2), %v1135_v1  ;;  %v169_v5 = vld [vmem:[%s1230_s1 + $0x4] sm:$0x3] (!%p137_p2)  ;;  %v172_v6 = vld [vmem:[%s1230_s1 + $0xa] sm:$0x3] (!%p137_p2)  ;;  %v171_v7 = vld [vmem:[%s1230_s1 + $0x8] sm:$0x3] (!%p137_p2) }
   0x8   : > { %1073 = vmatprep.subr.mxu1 (!%p137_p2), %v1135_v1  ;;  %1059 = vmatpush3.xpose.msk.msra.mxu0 (!%p137_p2), %vm173_vm0, %v167_v2  ;;  %vm798_vm3 = vcmask (!%p137_p2), 1045504   ;;  %v617_v22 = vld [vmem:[%s1231_s2] sm:$0x3f] (!%p137_p2)  ;;  %vm771_vm4 = vcmask (!%p137_p2), 46080   ;;  %vm794_vm5 = vcmask (!%p137_p2), 48128   ;;  %s1137_s5 = smov (!%p137_p2), 2  }
   0x9   : > { %1060 = vmatprep.mubr.msk.f32.mxu0 (!%p137_p2), %vm1136_vm1, %v1135_v1  ;;  %1068 = vmatprep.subr.mxu0 (!%p137_p2), %v1135_v1  ;;  %vm948_vm6 = vcmask (!%p137_p2), 13312   ;;  %vm954_vm7 = vcmask (!%p137_p2), 29712  }
   0xd   : > { %s1234_s13 = smov (!%p158_p3, %s1009_s13), 1 }
   0xe   : > { %s1014_s18 = sshll.u32 %s1234_s13, 3 }
   0xf   : > { %s161_s21 = scalar_lea.vmem %s1229_s0, %s1014_s18  ;;  %s165_s8 = scalar_lea.vmem %s1232_s3, %s1014_s18 }
  0x10   : > { %v166_v4 = vld [vmem:[%s161_s21] sm:$0x3f] }
  0x11   : > { %1066 = vmatmul.mubr.msk.f32.vlgmr.msra.gmra.mrb[0].mxu1 %vm173_vm0, %v166_v4  ;;  %1061 = vmatmul.mubr.msk.f32.vlgmr.msra.gmra.mrb[0].mxu0 %vm173_vm0, %v166_v4 }
  0x12   : > { %1074 = vmatpush3.xpose.msk.msra.mxu1 %vm173_vm0, %v170_v3  ;;  %1075 = vmatprep.mubr.msk.f32.mxu1 %vm1136_vm1, %v1135_v1 }
  0x13   : > { %1069 = vmatpush3.xpose.msk.msra.mxu0 %vm173_vm0, %v169_v5  ;;  %1070 = vmatprep.mubr.msk.f32.mxu0 %vm1136_vm1, %v1135_v1 }
  0x14   : > { %1083 = vmatprep.subr.mxu1 %v1135_v1  ;;  %1078 = vmatprep.subr.mxu0 %v1135_v1 }
  0x15   : > { %1076 = vmatmul.mubr.msk.f32.vlgmr.msra.gmra.mrb[2].mxu1 %vm173_vm0, %v166_v4 }
  0x16   : > { %1071 = vmatmul.mubr.msk.f32.vlgmr.msra.gmra.mrb[2].mxu0 %vm173_vm0, %v166_v4  ;;  %1085 = vmatprep.mubr.msk.f32.mxu1 %vm1136_vm1, %v1135_v1 }
  0x17   : > { %1080 = vmatprep.mubr.msk.f32.mxu0 %vm1136_vm1, %v1135_v1  ;;  %1084 = vmatpush3.xpose.msk.msra.mxu1 %vm173_vm0, %v172_v6 }
  0x18   : > { %1093 = vmatprep.subr.mxu1 %v1135_v1  ;;  %1079 = vmatpush3.xpose.msk.msra.mxu0 %vm173_vm0, %v171_v7 }
  0x19   : > { %1088 = vmatprep.subr.mxu0 %v1135_v1 }
  0x1a   : > { %1086 = vmatmul.mubr.msk.f32.vlgmr.msra.gmra.mrb[4].mxu1 %vm173_vm0, %v166_v4 }
  0x1b   : > { %1095 = vmatprep.mubr.msk.f32.mxu1 %vm1136_vm1, %v1135_v1  ;;  %1081 = vmatmul.mubr.msk.f32.vlgmr.msra.gmra.mrb[4].mxu0 %vm173_vm0, %v166_v4 }
  0x1c   : > { %1090 = vmatprep.mubr.msk.f32.mxu0 %vm1136_vm1, %v1135_v1 }
  0xe4   : > { %v319_v8 = vpop.f32.mrb[0].mxu1  ;;  %v246_v9 = vpop.f32.mrb[0].mxu0 }
  0xe5   : > { %v1067_v10 = vpop.f32.mrb[1].mxu1  ;;  %v1062_v11 = vpop.f32.mrb[1].mxu0  ;;  %v615_v14 = vmul.f32 0.70710677, %v246_v9  ;;  %v616_v16 = vmul.f32 0.70710677, %v319_v8 }
  0xe8   : > { %v465_v12 = vpop.f32.mrb[2].mxu1 }
  0xe9   : > { %v1077_v13 = vpop.f32.mrb[3].mxu1  ;;  %1094 = vmatpush3.xpose.msk.msra.mxu1 %vm618_vm2, %v465_v12  ;;  %v392_v15 = vpop.f32.mrb[2].mxu0 }
  0xea   : > { %1089 = vmatpush3.xpose.msk.msra.mxu0 %vm618_vm2, %v392_v15  ;;  %v1072_v17 = vpop.f32.mrb[3].mxu0  ;;  %1103 = vmatprep.subr.mxu1 %v1135_v1 }
  0xeb   : > { %1098 = vmatprep.subr.mxu0 %v1135_v1 }
  0xec   : > { %1096 = vmatmul.mubr.msk.f32.vlgmr.msra.gmra.mrb[6].mxu1 %vm618_vm2, %v616_v16 }
  0xed   : > { %1091 = vmatmul.mubr.msk.f32.vlgmr.msra.gmra.mrb[6].mxu0 %vm618_vm2, %v615_v14  ;;  %1105 = vmatprep.mubr.msk.f32.mxu1 %vm1136_vm1, %v1135_v1  ;;  %v611_v18 = vpop.f32.mrb[4].mxu1 }
  0xee   : > { %1100 = vmatprep.mubr.msk.f32.mxu0 %vm1136_vm1, %v1135_v1  ;;  %v1087_v19 = vpop.f32.mrb[5].mxu1  ;;  %1104 = vmatpush3.msk.msra.mxu1 %vm798_vm3, %v611_v18  ;;  %v538_v20 = vpop.f32.mrb[4].mxu0 }
  0xef   : > { %v1082_v21 = vpop.f32.mrb[5].mxu0  ;;  %1099 = vmatpush3.msk.msra.mxu0 %vm798_vm3, %v538_v20 }
 0x1bf   : > { %v767_v23 = vpop.f32.mrb[6].mxu1 }
 0x1c0   : > { %v768_v24 = vadd.f32 %v767_v23, %v617_v22  ;;  %v1097_v25 = vpop.f32.mrb[7].mxu1  ;;  %v691_v26 = vpop.f32.mrb[6].mxu0 }
 0x1c1   : > { %v692_v27 = vadd.f32 %v691_v26, %v617_v22  ;;  %v1092_v28 = vpop.f32.mrb[7].mxu0 }
 0x1c2   : > { %v775_v29 = vsel %vm771_vm4, %v768_v24, -inf }
 0x1c3   : > { %776 = vmax.xlane.f32.xlu0 %v775_v29  ;;  %v772_v30 = vsel %vm771_vm4, %v692_v27, -inf }
 0x1c7   : > { %773 = vmax.xlane.f32.xlu0 %v772_v30 }
 0x250   : > { %v777_v31 = vpop.xlane.xlu0 %776 }
 0x251   : > { %v779_v32 = vsub.f32 %v768_v24, %v777_v31 }
 0x253   : > { %v782_v33 = vmul.f32 1.442695, %v779_v32 }
 0x254   : > { %v774_v34 = vpop.xlane.xlu0 %773 }
 0x255   : > { %1119 = vpow2.f32 %v782_v33  ;;  %v778_v35 = vsub.f32 %v692_v27, %v774_v34 }
 0x257   : > { %v780_v36 = vmul.f32 1.442695, %v778_v35 }
 0x259   : > { %1121 = vpow2.f32 %v780_v36 }
 0x25f   : > { %v1120_v37 = vpop.eup %1119 }
 0x260   : > { %v787_v38 = vsel %vm771_vm4, %v1120_v37, 0.0 }
 0x261   : > { %788 = vadd.xlane.f32.xlu1 %v787_v38 }
 0x263   : > { %v1122_v39 = vpop.eup %1121 }
 0x264   : > { %v784_v40 = vsel %vm771_vm4, %v1122_v39, 0.0 }
 0x265   : > { %785 = vadd.xlane.f32.xlu1 %v784_v40 }
 0x2ee   : > { %v789_v41 = vpop.xlane.xlu1 %788 }
 0x2ef   : > { %1123 = vrcp.f32 %v789_v41 }
 0x2f2   : > { %v786_v42 = vpop.xlane.xlu1 %785 }
 0x2f3   : > { %1125 = vrcp.f32 %v786_v42 }
 0x2f9   : > { %v1124_v43 = vpop.eup %1123 }
 0x2fa   : > { %v793_v44 = vmul.f32 %v1124_v43, %v1120_v37 }
 0x2fc   : > { %1106 = vmatmul.mubr.msk.f32.vlgmr.msra.gmra.mrb[8].mxu1 %vm794_vm5, %v793_v44 }
 0x2fd   : > { %v1126_v45 = vpop.eup %1125 }
 0x2fe   : > { %v792_v46 = vmul.f32 %v1126_v45, %v1122_v39 }
 0x300   : > { %1101 = vmatmul.mubr.msk.f32.vlgmr.msra.gmra.mrb[8].mxu0 %vm794_vm5, %v792_v46 }
 0x3cf   : > { %v944_v47 = vpop.f32.mrb[8].mxu1 }
 0x3d0   : > { %v1107_v48 = vpop.f32.mrb[9].mxu1  ;;  %951 = vrot.lane.b32.xlu0 %v944_v47, %s1137_s5 }
 0x3d3   : > { %v868_v49 = vpop.f32.mrb[8].mxu0 }
 0x3d4   : > { %949 = vst.msk [vmem:[%s165_s8] sm:$0x3f] %vm948_vm6, %v868_v49  ;;  %v1102_v50 = vpop.f32.mrb[9].mxu0 }
 0x442   : > { %v952_v51 = vpop.permute.xlu0 %951 }
 0x443   : > { %955 = vst.msk [vmem:[%s165_s8] sm:$0x3f] %vm954_vm7, %v952_v51 }
 0x444 PF: > { %s13_s12 = sadd.s32 1, %s1133_s12  }
 0x445   : > { %p10_p4 = scmp.ge.s32.totalorder %s13_s12, 4  }
 0x447   :  { %12 = sbr.rel (!%p10_p4) target bundleno = 1 (0x1), region = 62 }

</bundles_post_ra>
